<compile_context>
chip_gen: v7x
topology: tpu7x:2x2x1
jax: 0.10.0
libtpu: 0.0.40
codegen_flags: <defaults>
</compile_context>

<pallas_src>
import functools

import jax
import jax.numpy as jnp
import numpy as np
from jax import lax
from jax.experimental import pallas as pl
from jax.experimental.pallas import tpu as pltpu

MARGIN = 0.5
EPS = 1e-8

# Budget (bytes) for the 4 live pipelined input buffers (2 inputs x 2 buffers).
# Conservative so it fits v5e's 16 MiB scoped-VMEM default and leaves headroom
# on v7x (64 MiB physical / 32 MiB scoped).
_INPUT_BUFFER_BUDGET = 12 * 1024 * 1024


def _round_up(x, m):
    return ((x + m - 1) // m) * m


def _choose_tiles(n, d, itemsize):
    """Pick (row_tile, k_tile) so the pipelined input buffers fit VMEM on all gens."""
    budget = _INPUT_BUFFER_BUDGET
    # K tile: full feature dim unless it is huge and cleanly splittable into
    # lane-aligned chunks that divide D exactly (no masking of OOB columns).
    tk = d
    if d % 128 == 0 and 4 * 256 * d * itemsize > budget:
        cap = max(128, budget // (4 * 256 * itemsize))  # keep >= ~256 rows/tile
        cand = (cap // 128) * 128
        while cand >= 128:
            if d % cand == 0:
                tk = cand
                break
            cand -= 128
    # Row tile: multiple of 8, as large as the budget allows (capped).
    tn = budget // (4 * tk * itemsize)
    tn = max(8, min((tn // 8) * 8, 1024))
    tn = min(tn, _round_up(n, 8))
    return tn, tk


def _cosine_distance_kernel(x_ref, y_ref, d_ref, dot_sc, nx_sc, ny_sc):
    """Per-row cosine distance, accumulated over the (trailing) feature grid axis."""
    k = pl.program_id(1)

    x = x_ref[...].astype(jnp.float32)   # (TN, TK)
    y = y_ref[...].astype(jnp.float32)   # (TN, TK)

    pdot = jnp.sum(x * y, axis=-1, keepdims=True)   # (TN, 1)
    pnx = jnp.sum(x * x, axis=-1, keepdims=True)
    pny = jnp.sum(y * y, axis=-1, keepdims=True)

    @pl.when(k == 0)
    def _():
        dot_sc[...] = jnp.zeros_like(dot_sc)
        nx_sc[...] = jnp.zeros_like(nx_sc)
        ny_sc[...] = jnp.zeros_like(ny_sc)

    dot_sc[...] += pdot
    nx_sc[...] += pnx
    ny_sc[...] += pny

    @pl.when(k == pl.num_programs(1) - 1)
    def _():
        # d = 1 - dot / max(||x||*||y||, eps); sqrt is monotone, so clamping
        # nx2*ny2 at eps^2 is equivalent, and rsqrt runs on the EUP (free slot).
        inv = lax.rsqrt(jnp.maximum(nx_sc[...] * ny_sc[...], jnp.float32(EPS * EPS)))
        d_ref[...] = 1.0 - dot_sc[...] * inv


def _hard_margin_finalize_kernel(d_ref, lab_ref, o_ref, *, margin):
    """Global thresholds + masked sums (O(N) scalar finalize, lane-dense input)."""
    d = d_ref[...]          # (R, 128) float32
    lab = lab_ref[...]      # (R, 128) float32; padded slots carry label -1.0

    is_pos = lab == 1.0
    is_neg = lab == 0.0
    n_pos = jnp.sum(is_pos.astype(jnp.float32))
    n_neg = jnp.sum(is_neg.astype(jnp.float32))

    neg_inf = jnp.float32(-jnp.inf)
    pos_inf = jnp.float32(jnp.inf)

    poss_max = jnp.max(jnp.where(is_pos, d, neg_inf))
    negs_min = jnp.min(jnp.where(is_neg, d, pos_inf))
    negs_mean = jnp.sum(jnp.where(is_neg, d, 0.0)) / n_neg
    poss_mean = jnp.sum(jnp.where(is_pos, d, 0.0)) / n_pos

    # Thresholds (matching the `len(...) > 1` conditions in the PyTorch code).
    neg_thr = jnp.where(n_pos > 1.0, poss_max, negs_mean)
    pos_thr = jnp.where(n_neg > 1.0, negs_min, poss_mean)

    pos_mask = is_pos & (d > pos_thr)
    neg_mask = is_neg & (d < neg_thr)

    positive_loss = jnp.sum(jnp.where(pos_mask, d * d, 0.0))
    relu_md = jnp.maximum(jnp.float32(margin) - d, 0.0)
    negative_loss = jnp.sum(jnp.where(neg_mask, relu_md * relu_md, 0.0))

    o_ref[...] = (positive_loss + negative_loss).reshape(1, 1)


def hard_margin_loss(rep_des, hidden, labels, margin=MARGIN, *,
                     row_tile=None, k_tile=None):
    """rep_des, hidden: (N, D) float; labels: (N,) of 0/1 -> scalar float32 loss.

    Inputs may be bfloat16 to halve HBM traffic of the bandwidth-bound pass 1;
    all accumulation is done in float32 inside the kernel.
    """
    n, d = rep_des.shape
    assert hidden.shape == (n, d), (rep_des.shape, hidden.shape)

    itemsize = rep_des.dtype.itemsize
    tn_auto, tk_auto = _choose_tiles(n, d, itemsize)
    tn = _round_up(int(row_tile), 8) if row_tile is not None else tn_auto
    tk = int(k_tile) if k_tile is not None else tk_auto
    if d % tk != 0:
        tk = d  # only split D when the split is exact (no OOB feature columns)

    g = pl.cdiv(n, tn)       # row tiles
    kt = d // tk             # feature-reduction tiles (tk divides d exactly)
    n_pad = g * tn

    # ---- Pass 1: per-row cosine distance (row-tiled, pipelined, megacore-able).
    d_vec = pl.pallas_call(
        _cosine_distance_kernel,
        out_shape=jax.ShapeDtypeStruct((n_pad, 1), jnp.float32),
        grid_spec=pltpu.PrefetchScalarGridSpec(
            num_scalar_prefetch=0,
            grid=(g, kt),
            in_specs=[
                pl.BlockSpec((tn, tk), lambda i, k: (i, k)),
                pl.BlockSpec((tn, tk), lambda i, k: (i, k)),
            ],
            out_specs=pl.BlockSpec((tn, 1), lambda i, k: (i, 0)),
            scratch_shapes=[pltpu.VMEM((tn, 1), jnp.float32)] * 3,
        ),
        compiler_params=pltpu.CompilerParams(
            dimension_semantics=("parallel", "arbitrary"),
            vmem_limit_bytes=32 * 1024 * 1024,
        ),
    )(rep_des, hidden)

    # ---- Repack pass-2 operands lane-dense (rows -> lanes) and pad labels.
    # Padded slots (row-tile tail + lane padding) get label -1 so the garbage
    # distances computed from out-of-bounds tail rows are excluded from both
    # the positive and negative sets.
    n_fin = _round_up(n_pad, 128)
    d_flat = d_vec.reshape(-1)
    if n_fin != n_pad:
        d_flat = jnp.pad(d_flat, (0, n_fin - n_pad))
    d2d = d_flat.reshape(n_fin // 128, 128)

    lab_flat = jnp.full((n_fin,), -1.0, dtype=jnp.float32)
    lab_flat = lab_flat.at[:n].set(labels.astype(jnp.float32))
    lab2d = lab_flat.reshape(n_fin // 128, 128)

    # ---- Pass 2: tiny global finalize (thresholds + masked sums).
    kernel2 = functools.partial(_hard_margin_finalize_kernel, margin=float(margin))
    out = pl.pallas_call(
        kernel2,
        out_shape=jax.ShapeDtypeStruct((1, 1), jnp.float32),
        grid_spec=pltpu.PrefetchScalarGridSpec(
            num_scalar_prefetch=0,
            grid=(1,),
            in_specs=[
                pl.BlockSpec((n_fin // 128, 128), lambda i: (0, 0)),
                pl.BlockSpec((n_fin // 128, 128), lambda i: (0, 0)),
            ],
            out_specs=pl.BlockSpec((1, 1), lambda i: (0, 0)),
        ),
        compiler_params=pltpu.CompilerParams(dimension_semantics=("arbitrary",)),
    )(d2d, lab2d)
    return out[0, 0]


def _numpy_reference(x, y, labels, margin=MARGIN):
    x = np.asarray(jnp.asarray(x, jnp.float32))
    y = np.asarray(jnp.asarray(y, jnp.float32))
    labels = np.asarray(labels)
    dot = np.sum(x * y, axis=-1)
    denom = np.maximum(np.linalg.norm(x, axis=-1) * np.linalg.norm(y, axis=-1), EPS)
    d = 1.0 - dot / denom
    negs = d[labels == 0]
    poss = d[labels == 1]
    neg_thr = poss.max() if len(poss) > 1 else negs.mean()
    pos_thr = negs.min() if len(negs) > 1 else poss.mean()
    negative_pairs = negs[negs < neg_thr]
    positive_pairs = poss[poss > pos_thr]
    positive_loss = np.sum(positive_pairs ** 2)
    negative_loss = np.sum(np.maximum(margin - negative_pairs, 0.0) ** 2)
    return np.float32(positive_loss + negative_loss)


if __name__ == "__main__":
    key = jax.random.PRNGKey(0)
    k1, k2, k3, k4 = jax.random.split(key, 4)

    # Case 1: small shapes, auto tiling (single row tile, single K tile).
    N1, D1 = 8, 32
    x1 = jax.random.normal(k1, (N1, D1), dtype=jnp.float32)
    y1 = jax.random.normal(k2, (N1, D1), dtype=jnp.float32)
    lab1 = jnp.array([0, 1, 0, 1, 1, 0, 0, 1], dtype=jnp.int32)
    loss1 = jax.block_until_ready(hard_margin_loss(x1, y1, lab1))
    ref1 = _numpy_reference(x1, y1, lab1)
    assert np.allclose(np.asarray(loss1), ref1, rtol=1e-5, atol=1e-5), (loss1, ref1)

    # Case 2: N not a multiple of the row tile — exercises the multi-tile
    # pipeline and tail-row masking (padded labels = -1).
    N2, D2 = 22, 32
    x2 = jax.random.normal(k3, (N2, D2), dtype=jnp.float32)
    y2 = jax.random.normal(k4, (N2, D2), dtype=jnp.float32)
    lab2 = (jnp.arange(N2) % 3 == 0).astype(jnp.int32)
    loss2 = jax.block_until_ready(hard_margin_loss(x2, y2, lab2, row_tile=8))
    ref2 = _numpy_reference(x2, y2, lab2)
    assert np.allclose(np.asarray(loss2), ref2, rtol=1e-5, atol=1e-5), (loss2, ref2)

    # Case 3: trailing feature-reduction grid axis (D split into 128-wide tiles).
    N3, D3 = 22, 256
    x3 = jax.random.normal(k1, (N3, D3), dtype=jnp.float32)
    y3 = jax.random.normal(k2, (N3, D3), dtype=jnp.float32)
    lab3 = (jnp.arange(N3) % 2).astype(jnp.int32)
    loss3 = jax.block_until_ready(hard_margin_loss(x3, y3, lab3, row_tile=8, k_tile=128))
    ref3 = _numpy_reference(x3, y3, lab3)
    assert np.allclose(np.asarray(loss3), ref3, rtol=1e-5, atol=1e-5), (loss3, ref3)

    # Case 4: exactly one positive label — exercises the `len(poss) > 1` else
    # branch (neg threshold falls back to negs.mean()).
    N4, D4 = 10, 32
    x4 = jax.random.normal(k3, (N4, D4), dtype=jnp.float32)
    y4 = jax.random.normal(k4, (N4, D4), dtype=jnp.float32)
    lab4 = jnp.zeros((N4,), dtype=jnp.int32).at[3].set(1)
    loss4 = jax.block_until_ready(hard_margin_loss(x4, y4, lab4))
    ref4 = _numpy_reference(x4, y4, lab4)
    assert np.allclose(np.asarray(loss4), ref4, rtol=1e-5, atol=1e-5), (loss4, ref4)

    print("KERNEL_OK")
</pallas_src>

<mosaic_0001>
module attributes {stable_mosaic.version = 11 : i64} {
  func.func @_cosine_distance_kernel(%arg0: i32, %arg1: i32, %arg2: memref<8x32xf32, #tpu.memory_space<vmem>>, %arg3: memref<8x32xf32, #tpu.memory_space<vmem>>, %arg4: memref<8x1xf32, #tpu.memory_space<vmem>>, %arg5: memref<8x1xf32, #tpu.memory_space<vmem>>, %arg6: memref<8x1xf32, #tpu.memory_space<vmem>>, %arg7: memref<8x1xf32, #tpu.memory_space<vmem>>) attributes {dimension_semantics = [#tpu.dimension_semantics<parallel>, #tpu.dimension_semantics<arbitrary>], iteration_bounds = array<i64: 1, 1>, scalar_prefetch = 0 : i64, scratch_operands = 3 : i64, tpu.core_type = #tpu.core_type<tc>, window_params = [{transform_indices = @transform_0, window_bounds = array<i64: 8, 32>}, {transform_indices = @transform_1, window_bounds = array<i64: 8, 32>}, {transform_indices = @transform_2, window_bounds = array<i64: 8, 1>}]} {
    %c0 = arith.constant 0 : index
    %c0_0 = arith.constant 0 : index
    %0 = vector.load %arg2[%c0, %c0_0] : memref<8x32xf32, #tpu.memory_space<vmem>>, vector<8x32xf32>
    %c0_1 = arith.constant 0 : index
    %c0_2 = arith.constant 0 : index
    %1 = vector.load %arg3[%c0_1, %c0_2] : memref<8x32xf32, #tpu.memory_space<vmem>>, vector<8x32xf32>
    %2 = arith.mulf %0, %1 : vector<8x32xf32>
    %cst = arith.constant dense<0.000000e+00> : vector<8xf32>
    %3 = vector.multi_reduction <add>, %2, %cst [1] : vector<8x32xf32> to vector<8xf32>
    %4 = vector.shape_cast %3 : vector<8xf32> to vector<8x1xf32>
    %5 = arith.mulf %0, %0 : vector<8x32xf32>
    %cst_3 = arith.constant dense<0.000000e+00> : vector<8xf32>
    %6 = vector.multi_reduction <add>, %5, %cst_3 [1] : vector<8x32xf32> to vector<8xf32>
    %7 = vector.shape_cast %6 : vector<8xf32> to vector<8x1xf32>
    %8 = arith.mulf %1, %1 : vector<8x32xf32>
    %cst_4 = arith.constant dense<0.000000e+00> : vector<8xf32>
    %9 = vector.multi_reduction <add>, %8, %cst_4 [1] : vector<8x32xf32> to vector<8xf32>
    %10 = vector.shape_cast %9 : vector<8xf32> to vector<8x1xf32>
    %c0_i32 = arith.constant 0 : i32
    %11 = arith.cmpi eq, %arg1, %c0_i32 : i32
    %12 = arith.extui %11 : i1 to i32
    %c0_i32_5 = arith.constant 0 : i32
    %13 = arith.cmpi ne, %12, %c0_i32_5 : i32
    scf.if %13 {
      %cst_20 = arith.constant 0.000000e+00 : f32
      %26 = vector.broadcast %cst_20 : f32 to vector<8x1xf32>
      %c0_21 = arith.constant 0 : index
      %c0_22 = arith.constant 0 : index
      %27 = vector.load %arg5[%c0_21, %c0_22] : memref<8x1xf32, #tpu.memory_space<vmem>>, vector<8x1xf32>
      tpu.vector_store %arg5[%c0_21, %c0_22], %26 {strides = array<i32>} : memref<8x1xf32, #tpu.memory_space<vmem>>, vector<8x1xf32>,
      %cst_23 = arith.constant 0.000000e+00 : f32
      %28 = vector.broadcast %cst_23 : f32 to vector<8x1xf32>
      %c0_24 = arith.constant 0 : index
      %c0_25 = arith.constant 0 : index
      %29 = vector.load %arg6[%c0_24, %c0_25] : memref<8x1xf32, #tpu.memory_space<vmem>>, vector<8x1xf32>
      tpu.vector_store %arg6[%c0_24, %c0_25], %28 {strides = array<i32>} : memref<8x1xf32, #tpu.memory_space<vmem>>, vector<8x1xf32>,
      %cst_26 = arith.constant 0.000000e+00 : f32
      %30 = vector.broadcast %cst_26 : f32 to vector<8x1xf32>
      %c0_27 = arith.constant 0 : index
      %c0_28 = arith.constant 0 : index
      %31 = vector.load %arg7[%c0_27, %c0_28] : memref<8x1xf32, #tpu.memory_space<vmem>>, vector<8x1xf32>
      tpu.vector_store %arg7[%c0_27, %c0_28], %30 {strides = array<i32>} : memref<8x1xf32, #tpu.memory_space<vmem>>, vector<8x1xf32>,
    } else {
    }
    %c0_6 = arith.constant 0 : index
    %c0_7 = arith.constant 0 : index
    %14 = vector.load %arg5[%c0_6, %c0_7] : memref<8x1xf32, #tpu.memory_space<vmem>>, vector<8x1xf32>
    %15 = arith.addf %14, %4 : vector<8x1xf32>
    %c0_8 = arith.constant 0 : index
    %c0_9 = arith.constant 0 : index
    %16 = vector.load %arg5[%c0_8, %c0_9] : memref<8x1xf32, #tpu.memory_space<vmem>>, vector<8x1xf32>
    tpu.vector_store %arg5[%c0_8, %c0_9], %15 {strides = array<i32>} : memref<8x1xf32, #tpu.memory_space<vmem>>, vector<8x1xf32>,
    %c0_10 = arith.constant 0 : index
    %c0_11 = arith.constant 0 : index
    %17 = vector.load %arg6[%c0_10, %c0_11] : memref<8x1xf32, #tpu.memory_space<vmem>>, vector<8x1xf32>
    %18 = arith.addf %17, %7 : vector<8x1xf32>
    %c0_12 = arith.constant 0 : index
    %c0_13 = arith.constant 0 : index
    %19 = vector.load %arg6[%c0_12, %c0_13] : memref<8x1xf32, #tpu.memory_space<vmem>>, vector<8x1xf32>
    tpu.vector_store %arg6[%c0_12, %c0_13], %18 {strides = array<i32>} : memref<8x1xf32, #tpu.memory_space<vmem>>, vector<8x1xf32>,
    %c0_14 = arith.constant 0 : index
    %c0_15 = arith.constant 0 : index
    %20 = vector.load %arg7[%c0_14, %c0_15] : memref<8x1xf32, #tpu.memory_space<vmem>>, vector<8x1xf32>
    %21 = arith.addf %20, %10 : vector<8x1xf32>
    %c0_16 = arith.constant 0 : index
    %c0_17 = arith.constant 0 : index
    %22 = vector.load %arg7[%c0_16, %c0_17] : memref<8x1xf32, #tpu.memory_space<vmem>>, vector<8x1xf32>
    tpu.vector_store %arg7[%c0_16, %c0_17], %21 {strides = array<i32>} : memref<8x1xf32, #tpu.memory_space<vmem>>, vector<8x1xf32>,
    %c0_i32_18 = arith.constant 0 : i32
    %23 = arith.cmpi eq, %arg1, %c0_i32_18 : i32
    %24 = arith.extui %23 : i1 to i32
    %c0_i32_19 = arith.constant 0 : i32
    %25 = arith.cmpi ne, %24, %c0_i32_19 : i32
    scf.if %25 {
      %c0_20 = arith.constant 0 : index
      %c0_21 = arith.constant 0 : index
      %26 = vector.load %arg6[%c0_20, %c0_21] : memref<8x1xf32, #tpu.memory_space<vmem>>, vector<8x1xf32>
      %c0_22 = arith.constant 0 : index
      %c0_23 = arith.constant 0 : index
      %27 = vector.load %arg7[%c0_22, %c0_23] : memref<8x1xf32, #tpu.memory_space<vmem>>, vector<8x1xf32>
      %28 = arith.mulf %26, %27 : vector<8x1xf32>
      %cst_24 = arith.constant 1.000000e-16 : f32
      %29 = vector.broadcast %cst_24 : f32 to vector<8x1xf32>
      %30 = arith.maximumf %28, %29 : vector<8x1xf32>
      %31 = math.rsqrt %30 : vector<8x1xf32>
      %c0_25 = arith.constant 0 : index
      %c0_26 = arith.constant 0 : index
      %32 = vector.load %arg5[%c0_25, %c0_26] : memref<8x1xf32, #tpu.memory_space<vmem>>, vector<8x1xf32>
      %33 = arith.mulf %32, %31 : vector<8x1xf32>
      %cst_27 = arith.constant 1.000000e+00 : f32
      %34 = vector.broadcast %cst_27 : f32 to vector<8x1xf32>
      %35 = arith.subf %34, %33 : vector<8x1xf32>
      %c0_28 = arith.constant 0 : index
      %c0_29 = arith.constant 0 : index
      %36 = vector.load %arg4[%c0_28, %c0_29] : memref<8x1xf32, #tpu.memory_space<vmem>>, vector<8x1xf32>
      tpu.vector_store %arg4[%c0_28, %c0_29], %35 {strides = array<i32>} : memref<8x1xf32, #tpu.memory_space<vmem>>, vector<8x1xf32>,
    } else {
    }
    return
  }
  func.func @transform_0(%arg0: i32, %arg1: i32) -> (i32, i32) {
    %c0_i32 = arith.constant 0 : i32
    return %arg0, %arg1 : i32, i32
  }
  func.func @transform_1(%arg0: i32, %arg1: i32) -> (i32, i32) {
    %c0_i32 = arith.constant 0 : i32
    return %arg0, %arg1 : i32, i32
  }
  func.func @transform_2(%arg0: i32, %arg1: i32) -> (i32, i32) {
    %c0_i32 = arith.constant 0 : i32
    %c0_i32_0 = arith.constant 0 : i32
    return %arg0, %c0_i32 : i32, i32
  }
}

</mosaic_0001>

<bundles_post_ra>
// kernel: tpu_custom_call.1
= control target key start
LH: loop header
LB: loop body
LE: loop exit
PB: predicated region body
PF: predicated region fallthrough
CT: control target
= control target key end

     0   :  { %7 = vsyncpa [#allocation6], 0  ;;  %s191_s0 = inlined_call_operand.hbm [shape: f32[8,32], index: 0, kind: input, shape index: {}]   ;;  %s192_s1 = inlined_call_operand.hbm [shape: f32[8,32], index: 1, kind: input, shape index: {}]   ;;  %s193_s2 = inlined_call_operand.vmem [shape: f32[8,1], index: 2, kind: output, shape index: {}]  }
   0x1   :  { %8 = vsyncpa [#allocation8], 0  ;;  %s139_s9 = smov [#allocation5]   ;;  %s140_s11 = smov [#allocation7]  }
   0x2   :  { %s15_s10 = sshll.u32 %s139_s9, 4  ;;  %s25_s12 = sshll.u32 %s140_s11, 4  ;;  %s16_s10 = int_to_ptr.vmem [resolvable:$true] %s15_s10  ;;  %s26_s12 = int_to_ptr.vmem [resolvable:$true] %s25_s12 }
   0x3   :  { %s91_s15 = scalar_lea.hbm %s191_s0, 128 }
   0x4   :  { %p92_p0 = scmp.ne.s32.totalorder %s191_s0, %s91_s15  ;;  %p95_p1 = scmp.lt.u32.totalorder %s91_s15, %s191_s0 }
   0x6   :  { %p97_p2 = pnand %p95_p1, %p92_p0 }
   0x8   :  { %100 = shalt.err (!%p97_p2)
}
   0x9   :  { %s101_s20 = scalar_lea.vmem %s16_s10, 128  ;;  %p106_p4 = scmp.lt.s32.totalorder %s16_s10, %s16_s10 }
   0xa   :  { %p102_p3 = scmp.ne.s32.totalorder %s16_s10, %s101_s20  ;;  %p107_p5 = scmp.lt.s32.totalorder %s101_s20, %s101_s20 }
   0xc   :  { %p108_p6 = por %p107_p5, %p106_p4 }
   0xe   :  { %p109_p7 = pnand %p108_p6, %p102_p3 }
  0x10   :  { %112 = shalt.err (!%p109_p7)
}
  0x11   :  { %18 = dma.hbm_to_vmem [thread:$0]  %s191_s0, 128, %s16_s10, [#allocation6]  }
  0x12   :  { %s113_s25 = scalar_lea.hbm %s192_s1, 128 }
  0x13   :  { %p114_p8 = scmp.ne.s32.totalorder %s192_s1, %s113_s25  ;;  %p117_p9 = scmp.lt.u32.totalorder %s113_s25, %s192_s1 }
  0x15   :  { %p119_p10 = pnand %p117_p9, %p114_p8 }
  0x17   :  { %122 = shalt.err (!%p119_p10)
}
  0x18   :  { %s123_s30 = scalar_lea.vmem %s26_s12, 128  ;;  %p128_p12 = scmp.lt.s32.totalorder %s26_s12, %s26_s12 }
  0x19   :  { %p124_p11 = scmp.ne.s32.totalorder %s26_s12, %s123_s30  ;;  %p129_p13 = scmp.lt.s32.totalorder %s123_s30, %s123_s30 }
  0x1b   :  { %p130_p0 = por %p129_p13, %p128_p12 }
  0x1d   :  { %p131_p1 = pnand %p130_p0, %p124_p11 }
  0x1f   :  { %134 = shalt.err (!%p131_p1)
}
  0x20   :  { %28 = dma.hbm_to_vmem [thread:$0]  %s192_s1, 128, %s26_s12, [#allocation8]  }
  0x21   :  { %135 = dma.done.wait [#allocation6], 128  }
  0x22   :  { %136 = vsyncadd [#allocation6], 4294967168 }
  0x23   :  { %137 = dma.done.wait [#allocation8], 128  }
  0x24   :  { %138 = vsyncadd [#allocation8], 4294967168  ;;  %vm54_vm0 = vcmask 7168   ;;  %v141_v0 = vmov 0.0   ;;  %v35_v1 = vld [vmem:[#allocation5] sm:$0xff]  ;;  %vm38_vm1 = vcmask 261120  }
  0x25   :  { %56 = vst.msk [vmem:[#allocation3] sm:$0xff] %vm54_vm0, %v141_v0  ;;  %55 = vst.msk [vmem:[#allocation2] sm:$0xff] %vm54_vm0, %v141_v0  ;;  %v36_v2 = vld [vmem:[#allocation7] sm:$0xff]  ;;  %v42_v3 = vmul.f32 %v35_v1, %v35_v1 }
  0x26   :  { %57 = vst.msk [vmem:[#allocation4] sm:$0xff] %vm54_vm0, %v141_v0  ;;  %v46_v4 = vmul.f32 %v36_v2, %v36_v2  ;;  %v37_v5 = vmul.f32 %v36_v2, %v35_v1 }
  0x27   :  { %v43_v6 = vsel %vm38_vm1, %v42_v3, 0.0 }
  0x28   :  { %v39_v7 = vsel %vm38_vm1, %v37_v5, 0.0  ;;  %44 = vadd.xlane.f32.xlu0 %v43_v6  ;;  %v47_v8 = vsel %vm38_vm1, %v46_v4, 0.0 }
  0x29   :  { %40 = vadd.xlane.f32.xlu1 %v39_v7 }
  0x2c   :  { %48 = vadd.xlane.f32.xlu0 %v47_v8  ;;  %v62_v9 = vld [vmem:[#allocation3] sm:$0xff]  ;;  %v58_v10 = vld [vmem:[#allocation2] sm:$0xff] }
  0x2d   :  { %v65_v15 = vld [vmem:[#allocation4] sm:$0xff] }
  0xb5   :  { %v45_v11 = vpop.xlane.xlu0 %44 }
  0xb6   :  { %v41_v12 = vpop.xlane.xlu1 %40  ;;  %v63_v13 = vadd.f32 %v62_v9, %v45_v11 }
  0xb7   :  { %v59_v14 = vadd.f32 %v58_v10, %v41_v12 }
  0xb8   :  { %64 = vst.msk [vmem:[#allocation3] sm:$0xff] %vm54_vm0, %v63_v13 }
  0xb9   :  { %61 = vst.msk [vmem:[#allocation2] sm:$0xff] %vm54_vm0, %v59_v14  ;;  %v49_v16 = vpop.xlane.xlu0 %48 }
  0xba   :  { %v66_v17 = vadd.f32 %v65_v15, %v49_v16 }
  0xbc   :  { %67 = vst.msk [vmem:[#allocation4] sm:$0xff] %vm54_vm0, %v66_v17 }
  0xbf   :  { %v71_v18 = vld [vmem:[#allocation3] sm:$0xff] }
  0xc0   :  { %v76_v22 = vld [vmem:[#allocation2] sm:$0xff] }
  0xc3   :  { %v72_v19 = vld [vmem:[#allocation4] sm:$0xff] }
  0xc4   :  { %v73_v20 = vmul.f32 %v72_v19, %v71_v18 }
  0xc6   :  { %v74_v21 = vmax.f32 %v73_v20, 1e-16 }
  0xc8   :  { %89 = vrsqrt.f32 %v74_v21 }
  0xd2   :  { %v90_v23 = vpop.eup %89 }
  0xd3   :  { %v77_v24 = vmul.f32 %v90_v23, %v76_v22 }
  0xd5   :  { %v78_v25 = vsub.f32 1.0, %v77_v24 }
  0xd7   :  { %79 = vst.msk [vmem:[%s193_s2] sm:$0xff] %vm54_vm0, %v78_v25 }
  0xd8   :  { %84 = vsyncpa [#allocation6], 1 }
  0xd9   :  { %85 = vsyncpa [#allocation8], 1 }

</bundles_post_ra>
